<compile_context>
chip_gen: v7x
topology: tpu7x:2x2x1
jax: 0.10.0
libtpu: 0.0.40
codegen_flags: <defaults>
</compile_context>

<pallas_src>
import functools

import jax
import jax.numpy as jnp
from jax.experimental import pallas as pl
from jax.experimental.pallas import tpu as pltpu

DROPOUT_P = 0.2
KEEP_P = 1.0 - DROPOUT_P
INV_KEEP = 1.0 / KEEP_P
# uint32 threshold with P(bits < THRESH) == KEEP_P (to within 2^-32).
KEEP_THRESHOLD = int(KEEP_P * (1 << 32))

H1, H2, H3 = 512, 128, 32
LANE = 128
SUBLANE = 8


def _round_up(x, m):
    return ((x + m - 1) // m) * m


def dqn_kernel(*refs, training: bool):
    if training:
        (x_ref, bits1_ref, bits2_ref,
         w1_ref, b1_ref, w2_ref, b2_ref,
         w3_ref, b3_ref, w4_ref, b4_ref, out_ref) = refs
    else:
        (x_ref,
         w1_ref, b1_ref, w2_ref, b2_ref,
         w3_ref, b3_ref, w4_ref, b4_ref, out_ref) = refs

    thresh = jnp.uint32(KEEP_THRESHOLD)

    # layer 1: Linear(state, 512) -> dropout -> relu  (dropout+relu fused)
    x = x_ref[...].astype(jnp.bfloat16)
    h = jnp.dot(x, w1_ref[...], preferred_element_type=jnp.float32) + b1_ref[...]
    if training:
        keep = bits1_ref[...] < thresh
        h = jnp.where(keep & (h > 0.0), h * INV_KEEP, 0.0)
    else:
        h = jnp.maximum(h, 0.0)

    # layer 2: Linear(512, 128) -> dropout -> relu  (dropout+relu fused)
    h = jnp.dot(h.astype(jnp.bfloat16), w2_ref[...],
                preferred_element_type=jnp.float32) + b2_ref[...]
    if training:
        keep = bits2_ref[...] < thresh
        h = jnp.where(keep & (h > 0.0), h * INV_KEEP, 0.0)
    else:
        h = jnp.maximum(h, 0.0)

    # layer 3: Linear(128, 32) -> relu
    h = jnp.dot(h.astype(jnp.bfloat16), w3_ref[...],
                preferred_element_type=jnp.float32) + b3_ref[...]
    h = jnp.maximum(h, 0.0)

    # layer 4: Linear(32, action_pad)  (lane-dense padded output)
    out = jnp.dot(h.astype(jnp.bfloat16), w4_ref[...],
                  preferred_element_type=jnp.float32) + b4_ref[...]
    out_ref[...] = out.astype(out_ref.dtype)


def dropout_dqn_forward(state, params, *, seed=0, training=False,
                        block_batch=256):
    """Forward pass of DropoutDeepQNetwork as one gridded Pallas kernel.

    state:  (B, state_size) float32
    params: dict with w1..w4 as (in, out) matrices and b1..b4 as (1, out)/(out,).
    """
    B, S = state.shape
    A = params["w4"].shape[1]
    A_pad = _round_up(A, LANE)

    # Batch tile: multiple of the f32 sublane (8), capped at block_batch.
    B8 = _round_up(B, SUBLANE)
    TB = min(_round_up(block_batch, SUBLANE), B8)
    B_pad = _round_up(B, TB)
    grid = (B_pad // TB,)

    x = jnp.zeros((B_pad, S), jnp.float32).at[:B].set(state.astype(jnp.float32))

    # bf16 weights (native MXU rate, half the DMA); f32 biases for the f32 add.
    w1 = params["w1"].astype(jnp.bfloat16)
    w2 = params["w2"].astype(jnp.bfloat16)
    w3 = params["w3"].astype(jnp.bfloat16)
    w4 = jnp.zeros((H3, A_pad), jnp.bfloat16).at[:, :A].set(
        params["w4"].astype(jnp.bfloat16))
    b1 = params["b1"].reshape(1, H1).astype(jnp.float32)
    b2 = params["b2"].reshape(1, H2).astype(jnp.float32)
    b3 = params["b3"].reshape(1, H3).astype(jnp.float32)
    b4 = jnp.zeros((1, A_pad), jnp.float32).at[:, :A].set(
        params["b4"].reshape(1, A).astype(jnp.float32))

    weight_args = (w1, b1, w2, b2, w3, b3, w4, b4)
    # Constant index_map -> weights/biases stay VMEM-resident across the grid.
    weight_specs = [pl.BlockSpec(a.shape, lambda i: (0, 0)) for a in weight_args]

    x_spec = pl.BlockSpec((TB, S), lambda i: (i, 0))
    out_spec = pl.BlockSpec((TB, A_pad), lambda i: (i, 0))

    if training:
        key = jax.random.PRNGKey(seed)
        k1, k2 = jax.random.split(key)
        bits1 = jax.random.bits(k1, (B_pad, H1), jnp.uint32)
        bits2 = jax.random.bits(k2, (B_pad, H2), jnp.uint32)
        inputs = (x, bits1, bits2) + weight_args
        in_specs = [x_spec,
                    pl.BlockSpec((TB, H1), lambda i: (i, 0)),
                    pl.BlockSpec((TB, H2), lambda i: (i, 0))] + weight_specs
    else:
        inputs = (x,) + weight_args
        in_specs = [x_spec] + weight_specs

    flops = 2 * B_pad * (S * H1 + H1 * H2 + H2 * H3 + H3 * A_pad)
    bytes_accessed = (
        int(x.size) * 4 + B_pad * A_pad * 4
        + sum(int(w.size) * 2 for w in (w1, w2, w3, w4))
        + sum(int(b.size) * 4 for b in (b1, b2, b3, b4))
        + (B_pad * (H1 + H2) * 4 if training else 0))

    kernel = functools.partial(dqn_kernel, training=training)
    out = pl.pallas_call(
        kernel,
        out_shape=jax.ShapeDtypeStruct((B_pad, A_pad), jnp.float32),
        grid=grid,
        in_specs=in_specs,
        out_specs=out_spec,
        compiler_params=pltpu.CompilerParams(
            dimension_semantics=("parallel",)),
        cost_estimate=pl.CostEstimate(
            flops=flops, transcendentals=0, bytes_accessed=bytes_accessed),
    )(*inputs)
    return out[:B, :A]


def init_params(key, state_size, action_size):
    """Deterministic init mirroring nn.Linear default (uniform +-1/sqrt(fan_in)).

    Weights stored as (in_features, out_features)."""
    dims = [(state_size, H1), (H1, H2), (H2, H3), (H3, action_size)]
    params = {}
    for i, (fan_in, fan_out) in enumerate(dims, start=1):
        key, kw, kb = jax.random.split(key, 3)
        bound = 1.0 / jnp.sqrt(float(fan_in))
        params[f"w{i}"] = jax.random.uniform(
            kw, (fan_in, fan_out), jnp.float32, -bound, bound)
        params[f"b{i}"] = jax.random.uniform(
            kb, (1, fan_out), jnp.float32, -bound, bound)
    return params


def reference_forward_eval(state, params):
    """Pure-JAX reference (eval mode) using the same bf16-in / f32-acc matmuls."""
    def lin(h, w, b):
        return jnp.dot(h.astype(jnp.bfloat16), w.astype(jnp.bfloat16),
                       preferred_element_type=jnp.float32) + b.reshape(1, -1)
    h = jnp.maximum(lin(state, params["w1"], params["b1"]), 0.0)
    h = jnp.maximum(lin(h, params["w2"], params["b2"]), 0.0)
    h = jnp.maximum(lin(h, params["w3"], params["b3"]), 0.0)
    return lin(h, params["w4"], params["b4"])


if __name__ == "__main__":
    key = jax.random.PRNGKey(0)
    batch, state_size, action_size = 2, 16, 4

    k_params, k_state = jax.random.split(key)
    params = init_params(k_params, state_size, action_size)
    state = jax.random.normal(k_state, (batch, state_size), jnp.float32)

    # Eval-mode forward (dropout = identity), compared against pure-JAX ref.
    q_vals = dropout_dqn_forward(state, params, training=False)
    q_vals = jax.block_until_ready(q_vals)
    ref = reference_forward_eval(state, params)
    assert q_vals.shape == (batch, action_size)
    assert jnp.allclose(q_vals, ref, atol=1e-2, rtol=1e-2), (q_vals, ref)

    # Training-mode forward (stochastic inverted dropout, p=0.2).
    q_train = dropout_dqn_forward(state, params, seed=123, training=True)
    q_train = jax.block_until_ready(q_train)
    assert q_train.shape == (batch, action_size)
    assert bool(jnp.all(jnp.isfinite(q_train)))

    print("KERNEL_OK")
</pallas_src>

<mosaic_0001>
module attributes {stable_mosaic.version = 11 : i64} {
  func.func @dqn_kernel(%arg0: i32, %arg1: memref<8x16xf32, #tpu.memory_space<vmem>>, %arg2: memref<16x512xbf16, #tpu.memory_space<vmem>>, %arg3: memref<1x512xf32, #tpu.memory_space<vmem>>, %arg4: memref<512x128xbf16, #tpu.memory_space<vmem>>, %arg5: memref<1x128xf32, #tpu.memory_space<vmem>>, %arg6: memref<128x32xbf16, #tpu.memory_space<vmem>>, %arg7: memref<1x32xf32, #tpu.memory_space<vmem>>, %arg8: memref<32x128xbf16, #tpu.memory_space<vmem>>, %arg9: memref<1x128xf32, #tpu.memory_space<vmem>>, %arg10: memref<8x128xf32, #tpu.memory_space<vmem>>) attributes {dimension_semantics = [#tpu.dimension_semantics<parallel>], iteration_bounds = array<i64: 1>, scalar_prefetch = 0 : i64, scratch_operands = 0 : i64, tpu.core_type = #tpu.core_type<tc>, window_params = [{transform_indices = @transform_0, window_bounds = array<i64: 8, 16>}, {pipeline_mode = #tpu.pipeline_mode<synchronous>, transform_indices = @transform_1, window_bounds = array<i64: 16, 512>}, {pipeline_mode = #tpu.pipeline_mode<synchronous>, transform_indices = @transform_2, window_bounds = array<i64: 1, 512>}, {pipeline_mode = #tpu.pipeline_mode<synchronous>, transform_indices = @transform_3, window_bounds = array<i64: 512, 128>}, {pipeline_mode = #tpu.pipeline_mode<synchronous>, transform_indices = @transform_4, window_bounds = array<i64: 1, 128>}, {pipeline_mode = #tpu.pipeline_mode<synchronous>, transform_indices = @transform_5, window_bounds = array<i64: 128, 32>}, {pipeline_mode = #tpu.pipeline_mode<synchronous>, transform_indices = @transform_6, window_bounds = array<i64: 1, 32>}, {pipeline_mode = #tpu.pipeline_mode<synchronous>, transform_indices = @transform_7, window_bounds = array<i64: 32, 128>}, {pipeline_mode = #tpu.pipeline_mode<synchronous>, transform_indices = @transform_8, window_bounds = array<i64: 1, 128>}, {transform_indices = @transform_9, window_bounds = array<i64: 8, 128>}]} {
    %c0 = arith.constant 0 : index
    %c0_0 = arith.constant 0 : index
    %0 = vector.load %arg1[%c0, %c0_0] : memref<8x16xf32, #tpu.memory_space<vmem>>, vector<8x16xf32>
    %1 = arith.truncf %0 : vector<8x16xf32> to vector<8x16xbf16>
    %c0_1 = arith.constant 0 : index
    %c0_2 = arith.constant 0 : index
    %2 = vector.load %arg2[%c0_1, %c0_2] : memref<16x512xbf16, #tpu.memory_space<vmem>>, vector<16x512xbf16>
    %cst = arith.constant dense<0.000000e+00> : vector<8x512xf32>
    %3 = tpu.matmul %1, %2, %cst {dimension_numbers = #tpu.dot_dimension_numbers<[1], [0], [0], [1], [0, 0, 1, 1], [], []>} : vector<8x16xbf16>, vector<16x512xbf16>, vector<8x512xf32> -> vector<8x512xf32>
    %c0_3 = arith.constant 0 : index
    %c0_4 = arith.constant 0 : index
    %4 = vector.load %arg3[%c0_3, %c0_4] : memref<1x512xf32, #tpu.memory_space<vmem>>, vector<1x512xf32>
    %5 = vector.broadcast %4 : vector<1x512xf32> to vector<8x512xf32>
    %6 = arith.addf %3, %5 : vector<8x512xf32>
    %cst_5 = arith.constant 0.000000e+00 : f32
    %7 = vector.broadcast %cst_5 : f32 to vector<8x512xf32>
    %8 = arith.maximumf %6, %7 : vector<8x512xf32>
    %9 = arith.truncf %8 : vector<8x512xf32> to vector<8x512xbf16>
    %c0_6 = arith.constant 0 : index
    %c0_7 = arith.constant 0 : index
    %10 = vector.load %arg4[%c0_6, %c0_7] : memref<512x128xbf16, #tpu.memory_space<vmem>>, vector<512x128xbf16>
    %cst_8 = arith.constant dense<0.000000e+00> : vector<8x128xf32>
    %11 = tpu.matmul %9, %10, %cst_8 {dimension_numbers = #tpu.dot_dimension_numbers<[1], [0], [0], [1], [0, 0, 1, 1], [], []>} : vector<8x512xbf16>, vector<512x128xbf16>, vector<8x128xf32> -> vector<8x128xf32>
    %c0_9 = arith.constant 0 : index
    %c0_10 = arith.constant 0 : index
    %12 = vector.load %arg5[%c0_9, %c0_10] : memref<1x128xf32, #tpu.memory_space<vmem>>, vector<1x128xf32>
    %13 = vector.broadcast %12 : vector<1x128xf32> to vector<8x128xf32>
    %14 = arith.addf %11, %13 : vector<8x128xf32>
    %cst_11 = arith.constant 0.000000e+00 : f32
    %15 = vector.broadcast %cst_11 : f32 to vector<8x128xf32>
    %16 = arith.maximumf %14, %15 : vector<8x128xf32>
    %17 = arith.truncf %16 : vector<8x128xf32> to vector<8x128xbf16>
    %c0_12 = arith.constant 0 : index
    %c0_13 = arith.constant 0 : index
    %18 = vector.load %arg6[%c0_12, %c0_13] : memref<128x32xbf16, #tpu.memory_space<vmem>>, vector<128x32xbf16>
    %cst_14 = arith.constant dense<0.000000e+00> : vector<8x32xf32>
    %19 = tpu.matmul %17, %18, %cst_14 {dimension_numbers = #tpu.dot_dimension_numbers<[1], [0], [0], [1], [0, 0, 1, 1], [], []>} : vector<8x128xbf16>, vector<128x32xbf16>, vector<8x32xf32> -> vector<8x32xf32>
    %c0_15 = arith.constant 0 : index
    %c0_16 = arith.constant 0 : index
    %20 = vector.load %arg7[%c0_15, %c0_16] : memref<1x32xf32, #tpu.memory_space<vmem>>, vector<1x32xf32>
    %21 = vector.broadcast %20 : vector<1x32xf32> to vector<8x32xf32>
    %22 = arith.addf %19, %21 : vector<8x32xf32>
    %cst_17 = arith.constant 0.000000e+00 : f32
    %23 = vector.broadcast %cst_17 : f32 to vector<8x32xf32>
    %24 = arith.maximumf %22, %23 : vector<8x32xf32>
    %25 = arith.truncf %24 : vector<8x32xf32> to vector<8x32xbf16>
    %c0_18 = arith.constant 0 : index
    %c0_19 = arith.constant 0 : index
    %26 = vector.load %arg8[%c0_18, %c0_19] : memref<32x128xbf16, #tpu.memory_space<vmem>>, vector<32x128xbf16>
    %cst_20 = arith.constant dense<0.000000e+00> : vector<8x128xf32>
    %27 = tpu.matmul %25, %26, %cst_20 {dimension_numbers = #tpu.dot_dimension_numbers<[1], [0], [0], [1], [0, 0, 1, 1], [], []>} : vector<8x32xbf16>, vector<32x128xbf16>, vector<8x128xf32> -> vector<8x128xf32>
    %c0_21 = arith.constant 0 : index
    %c0_22 = arith.constant 0 : index
    %28 = vector.load %arg9[%c0_21, %c0_22] : memref<1x128xf32, #tpu.memory_space<vmem>>, vector<1x128xf32>
    %29 = vector.broadcast %28 : vector<1x128xf32> to vector<8x128xf32>
    %30 = arith.addf %27, %29 : vector<8x128xf32>
    %c0_23 = arith.constant 0 : index
    %c0_24 = arith.constant 0 : index
    %31 = vector.load %arg10[%c0_23, %c0_24] : memref<8x128xf32, #tpu.memory_space<vmem>>, vector<8x128xf32>
    tpu.vector_store %arg10[%c0_23, %c0_24], %30 {strides = array<i32>} : memref<8x128xf32, #tpu.memory_space<vmem>>, vector<8x128xf32>,
    return
  }
  func.func @transform_0(%arg0: i32) -> (i32, i32) {
    %c0_i32 = arith.constant 0 : i32
    %c0_i32_0 = arith.constant 0 : i32
    return %arg0, %c0_i32 : i32, i32
  }
  func.func @transform_1(%arg0: i32) -> (i32, i32) {
    %c0_i32 = arith.constant 0 : i32
    %c0_i32_0 = arith.constant 0 : i32
    %c0_i32_1 = arith.constant 0 : i32
    return %c0_i32, %c0_i32_0 : i32, i32
  }
  func.func @transform_2(%arg0: i32) -> (i32, i32) {
    %c0_i32 = arith.constant 0 : i32
    %c0_i32_0 = arith.constant 0 : i32
    %c0_i32_1 = arith.constant 0 : i32
    return %c0_i32, %c0_i32_0 : i32, i32
  }
  func.func @transform_3(%arg0: i32) -> (i32, i32) {
    %c0_i32 = arith.constant 0 : i32
    %c0_i32_0 = arith.constant 0 : i32
    %c0_i32_1 = arith.constant 0 : i32
    return %c0_i32, %c0_i32_0 : i32, i32
  }
  func.func @transform_4(%arg0: i32) -> (i32, i32) {
    %c0_i32 = arith.constant 0 : i32
    %c0_i32_0 = arith.constant 0 : i32
    %c0_i32_1 = arith.constant 0 : i32
    return %c0_i32, %c0_i32_0 : i32, i32
  }
  func.func @transform_5(%arg0: i32) -> (i32, i32) {
    %c0_i32 = arith.constant 0 : i32
    %c0_i32_0 = arith.constant 0 : i32
    %c0_i32_1 = arith.constant 0 : i32
    return %c0_i32, %c0_i32_0 : i32, i32
  }
  func.func @transform_6(%arg0: i32) -> (i32, i32) {
    %c0_i32 = arith.constant 0 : i32
    %c0_i32_0 = arith.constant 0 : i32
    %c0_i32_1 = arith.constant 0 : i32
    return %c0_i32, %c0_i32_0 : i32, i32
  }
  func.func @transform_7(%arg0: i32) -> (i32, i32) {
    %c0_i32 = arith.constant 0 : i32
    %c0_i32_0 = arith.constant 0 : i32
    %c0_i32_1 = arith.constant 0 : i32
    return %c0_i32, %c0_i32_0 : i32, i32
  }
  func.func @transform_8(%arg0: i32) -> (i32, i32) {
    %c0_i32 = arith.constant 0 : i32
    %c0_i32_0 = arith.constant 0 : i32
    %c0_i32_1 = arith.constant 0 : i32
    return %c0_i32, %c0_i32_0 : i32, i32
  }
  func.func @transform_9(%arg0: i32) -> (i32, i32) {
    %c0_i32 = arith.constant 0 : i32
    %c0_i32_0 = arith.constant 0 : i32
    return %arg0, %c0_i32 : i32, i32
  }
}

</mosaic_0001>

<bundles_post_ra>
// kernel: tpu_custom_call.1
= control target key start
LH: loop header
LB: loop body
LE: loop exit
PB: predicated region body
PF: predicated region fallthrough
CT: control target
= control target key end

     0   :  { %14 = vsyncpa [#allocation3], 0  ;;  %s1122_s0 = inlined_call_operand.vmem [shape: f32[8,16], index: 0, kind: input, shape index: {}]   ;;  %s1123_s1 = inlined_call_operand.vmem [shape: bf16[16,512], index: 1, kind: input, shape index: {}]   ;;  %s1124_s2 = inlined_call_operand.vmem [shape: f32[1,512], index: 2, kind: input, shape index: {}]   ;;  %s1125_s3 = inlined_call_operand.hbm [shape: bf16[512,128], index: 3, kind: input, shape index: {}]   ;;  %s1126_s4 = inlined_call_operand.vmem [shape: f32[1,128], index: 4, kind: input, shape index: {}]   ;;  %s1127_s5 = inlined_call_operand.vmem [shape: bf16[128,32], index: 5, kind: input, shape index: {}]   ;;  %s1128_s6 = inlined_call_operand.vmem [shape: f32[1,32], index: 6, kind: input, shape index: {}]   ;;  %s1129_s7 = inlined_call_operand.vmem [shape: bf16[32,128], index: 7, kind: input, shape index: {}]   ;;  %s1130_s8 = inlined_call_operand.vmem [shape: f32[1,128], index: 8, kind: input, shape index: {}]   ;;  %s1131_s9 = inlined_call_operand.hbm [shape: f32[8,128], index: 9, kind: output, shape index: {}]  }
   0x1   :  { %15 = vsyncpa [#allocation4], 0  ;;  %s970_s30 = smov [#allocation2]   ;;  %s922_s13 = scalar_lea.hbm %s1125_s3, 4096 }
   0x2   :  { %s27_s10 = sshll.u32 %s970_s30, 4  ;;  %p923_p0 = scmp.ne.s32.totalorder %s1125_s3, %s922_s13  ;;  %s28_s10 = int_to_ptr.vmem [resolvable:$true] %s27_s10 }
   0x3   :  { %p926_p1 = scmp.lt.u32.totalorder %s922_s13, %s1125_s3 }
   0x5   :  { %p928_p2 = pnand %p926_p1, %p923_p0 }
   0x7   :  { %931 = shalt.err (!%p928_p2)
}
   0x8   :  { %s932_s18 = scalar_lea.vmem %s28_s10, 4096  ;;  %p937_p4 = scmp.lt.s32.totalorder %s28_s10, %s28_s10 }
   0x9   :  { %p933_p3 = scmp.ne.s32.totalorder %s28_s10, %s932_s18  ;;  %p938_p5 = scmp.lt.s32.totalorder %s932_s18, %s932_s18 }
   0xb   :  { %p939_p6 = por %p938_p5, %p937_p4 }
   0xd   :  { %p940_p7 = pnand %p939_p6, %p933_p3 }
   0xf   :  { %943 = shalt.err (!%p940_p7)
}
  0x10   :  { %s971_s19 = smov 64   ;;  %s972_s20 = smov 4  }
  0x11   :  { %33 = dma.hbm_to_vmem [thread:$0]  %s1125_s3, 4096, %s28_s10, [#allocation3], %s971_s19, %s971_s19, %s972_s20  }
  0x12   :  { %966 = dma.done.wait [#allocation3], 4096  }
  0x13   :  { %967 = vsyncadd [#allocation3], 4294963200  ;;  %v973_v0 = vmov 0   ;;  %v874_v1 = vld [vmem:[%s1123_s1 + $0x4] ss:$16 sps:$4 sm:$0xff]   ;;  %vm96_vm0 = vcmask 130048   ;;  %v56_v40 = vlaneseq }
  0x14   :  { %132 = vmatprep.mubr.bf16.mxu1 %v973_v0  ;;  %v876_v2 = vld [vmem:[%s1123_s1] ss:$16 sps:$4 sm:$0xff]   ;;  %100 = vmatprep.subr.bf16.mxu1 %v874_v1  ;;  %v877_v5 = vld [vmem:[%s1123_s1 + $0x8] ss:$16 sps:$4 sm:$0xff]   ;;  %v879_v6 = vld [vmem:[%s1123_s1 + $0xc] ss:$16 sps:$4 sm:$0xff]  }
  0x15   :  { %v48_v3 = vld [vmem:[%s1122_s0] sm:$0xff]  ;;  %101 = vmatpush1.bf16.msra.mxu1 %v876_v2  ;;  %v882_v9 = vld [vmem:[#allocation2 + $0x48] sm:$0xff]   ;;  %v884_v11 = vld [vmem:[#allocation2 + $0x50] sm:$0xff]   ;;  %v974_v39 = vmov 0.0   ;;  %v57_v41 = vshrl.u32 %v56_v40, 7  ;;  %vm975_vm1 = vmmov 0  }
  0x16   :  { %v49_v4 = vpack.c.bf16 %v48_v3, %v48_v3  ;;  %v880_v7 = vld [vmem:[#allocation2 + $0x40] sm:$0xff]   ;;  %141 = vmatprep.subr.bf16.mxu1 %v879_v6  ;;  %v883_v10 = vld [vmem:[#allocation2 + $0x8] sm:$0xff]   ;;  %v886_v13 = vld [vmem:[#allocation2 + $0x10] sm:$0xff]   ;;  %vm671_vm2 = vcmask 261120   ;;  %s976_s1 = smov [#allocation5]  }
  0x17   :  { %v881_v8 = vld [vmem:[#allocation2] sm:$0xff]   ;;  %783 = vmatprep.subr.bf16.mxu0 %v880_v7  ;;  %v888_v15 = vld [vmem:[#allocation2 + $0x58] sm:$0xff]   ;;  %v889_v16 = vld [vmem:[#allocation2 + $0xc8] sm:$0xff]   ;;  %v58_v42 = vsub.s32 0, %v57_v41  ;;  %v62_v44 = vsub.s32 1, %v57_v41  ;;  %v66_v50 = vsub.s32 2, %v57_v41 }
  0x18   :  { %735 = vmatmul.mubr.msk.bf16.vlgmr.msra.gmra.mrb[0].mxu1 %vm96_vm0, %v49_v4  ;;  %784 = vmatpush3.bf16.msra.mxu0 %v881_v8  ;;  %v885_v12 = vld [vmem:[#allocation2 + $0xc0] sm:$0xff]   ;;  %v890_v17 = vld [vmem:[#allocation2 + $0x18] sm:$0xff]   ;;  %v891_v18 = vld [vmem:[#allocation2 + $0x88] sm:$0xff]   ;;  %v70_v53 = vsub.s32 3, %v57_v41 }
  0x19   :  { %142 = vmatpush1.bf16.msra.mxu1 %v877_v5  ;;  %173 = vmatprep.mubr.bf16.mxu1 %v973_v0  ;;  %v887_v14 = vld [vmem:[#allocation2 + $0x80] sm:$0xff]   ;;  %v893_v20 = vld [vmem:[#allocation2 + $0xd0] sm:$0xff]   ;;  %v896_v23 = vld [vmem:[#allocation2 + $0x68] sm:$0xff]  }
  0x1a   :  { %785 = vmatprep.subr.bf16.mxu0 %v882_v9  ;;  %805 = vmatprep.subr.bf16.mxu1 %v885_v12  ;;  %v892_v19 = vld [vmem:[#allocation2 + $0x60] sm:$0xff]   ;;  %v895_v22 = vld [vmem:[#allocation2 + $0x90] sm:$0xff]   ;;  %v897_v24 = vld [vmem:[#allocation2 + $0xd8] sm:$0xff]  }
  0x1b   :  { %v894_v21 = vld [vmem:[#allocation2 + $0x20] sm:$0xff]   ;;  %v898_v25 = vld [vmem:[#allocation2 + $0x28] sm:$0xff]   ;;  %v899_v26 = vld [vmem:[#allocation2 + $0x98] sm:$0xff]  }
  0x1c   :  { %786 = vmatpush3.bf16.msra.mxu0 %v883_v10  ;;  %v900_v27 = vld [vmem:[#allocation2 + $0x70] sm:$0xff]   ;;  %v901_v28 = vld [vmem:[#allocation2 + $0xe0] sm:$0xff]   ;;  %v904_v31 = vld [vmem:[#allocation2 + $0x78] sm:$0xff]  }
  0x1d   :  { %787 = vmatprep.subr.bf16.mxu0 %v884_v11  ;;  %v902_v29 = vld [vmem:[#allocation2 + $0x30] sm:$0xff]   ;;  %v903_v30 = vld [vmem:[#allocation2 + $0xa0] sm:$0xff]   ;;  %v905_v32 = vld [vmem:[#allocation2 + $0xe8] sm:$0xff]  }
  0x1e   :  { %v906_v33 = vld [vmem:[#allocation2 + $0x38] sm:$0xff]   ;;  %v907_v34 = vld [vmem:[#allocation2 + $0xa8] sm:$0xff]   ;;  %v908_v35 = vld [vmem:[#allocation2 + $0xf0] sm:$0xff]  }
  0x1f   :  { %v909_v36 = vld [vmem:[#allocation2 + $0xb0] sm:$0xff]   ;;  %v910_v37 = vld [vmem:[#allocation2 + $0xf8] sm:$0xff]   ;;  %v54_v43 = vld [vmem:[%s1124_s2] sm:$0xf] }
  0x20   :  { %736 = vmatmul.mubr.msk.bf16.vlgmr.msra.gmra.mrb[4].mxu1 %vm96_vm0, %v49_v4  ;;  %788 = vmatpush3.bf16.msra.mxu0 %v886_v13  ;;  %v911_v38 = vld [vmem:[#allocation2 + $0xb8] sm:$0xff]   ;;  %v59_v45 = vrot.slane %v54_v43, %v58_v42  ;;  %v63_v46 = vrot.slane %v54_v43, %v62_v44  ;;  %v67_v57 = vrot.slane %v54_v43, %v66_v50  ;;  %v912_v60 = vld [vmem:[%s1127_s5] sm:$0xff]   ;;  %v913_v3 = vld [vmem:[%s1127_s5 + $0x8] sm:$0xff]  }
  0x21   :  { %806 = vmatpush3.bf16.msra.mxu1 %v887_v14  ;;  %789 = vmatprep.subr.bf16.mxu0 %v888_v15  ;;  %v71_v59 = vrot.slane %v54_v43, %v70_v53  ;;  %v914_v8 = vld [vmem:[%s1127_s5 + $0x10] sm:$0xff]   ;;  %v915_v10 = vld [vmem:[%s1127_s5 + $0x18] sm:$0xff]   ;;  %v916_v11 = vld [vmem:[%s1127_s5 + $0x20] sm:$0xff]  }
  0x22   :  { %807 = vmatprep.subr.bf16.mxu1 %v889_v16  ;;  %v917_v12 = vld [vmem:[%s1127_s5 + $0x28] sm:$0xff]   ;;  %v918_v13 = vld [vmem:[%s1127_s5 + $0x30] sm:$0xff]   ;;  %v919_v14 = vld [vmem:[%s1127_s5 + $0x38] sm:$0xff]  }
  0x24   :  { %790 = vmatpush3.bf16.msra.mxu0 %v890_v17 }
  0x25   :  { %808 = vmatpush3.bf16.msra.mxu1 %v891_v18  ;;  %791 = vmatprep.subr.bf16.mxu0 %v892_v19 }
  0x26   :  { %809 = vmatprep.subr.bf16.mxu1 %v893_v20  ;;  %v737_v20 = vld [vmem:[%s1126_s4] ss:$0 sm:$0xff] }
  0x28   :  { %792 = vmatpush3.bf16.msra.mxu0 %v894_v21 }
  0x29   :  { %810 = vmatpush3.bf16.msra.mxu1 %v895_v22  ;;  %793 = vmatprep.subr.bf16.mxu0 %v896_v23 }
  0x2a   :  { %811 = vmatprep.subr.bf16.mxu1 %v897_v24 }
  0x2c   :  { %794 = vmatpush3.bf16.msra.mxu0 %v898_v25 }
  0x2d   :  { %812 = vmatpush3.bf16.msra.mxu1 %v899_v26  ;;  %795 = vmatprep.subr.bf16.mxu0 %v900_v27 }
  0x2e   :  { %813 = vmatprep.subr.bf16.mxu1 %v901_v28 }
  0x30   :  { %796 = vmatpush3.bf16.msra.mxu0 %v902_v29 }
  0x31   :  { %814 = vmatpush3.bf16.msra.mxu1 %v903_v30  ;;  %797 = vmatprep.subr.bf16.mxu0 %v904_v31  ;;  %v920_v30 = vld [vmem:[%s1129_s7] sm:$0xff]   ;;  %v921_v31 = vld [vmem:[%s1129_s7 + $0x8] sm:$0xff]   ;;  %s722_s7 = sshll.u32 %s976_s1, 4  ;;  %s723_s7 = int_to_ptr.vmem [resolvable:$true] %s722_s7 }
  0x32   :  { %815 = vmatprep.subr.bf16.mxu1 %v905_v32  ;;  %v770_v32 = vld [vmem:[%s1128_s6] ss:$0 sm:$0xff]  ;;  %s944_s6 = scalar_lea.vmem %s723_s7, 128  ;;  %p949_p9 = scmp.lt.s32.totalorder %s723_s7, %s723_s7 }
  0x33   :  { %p945_p8 = scmp.ne.s32.totalorder %s723_s7, %s944_s6  ;;  %p950_p10 = scmp.lt.s32.totalorder %s944_s6, %s944_s6 }
  0x34   :  { %798 = vmatpush3.bf16.msra.mxu0 %v906_v33 }
  0x35   :  { %816 = vmatpush3.bf16.msra.mxu1 %v907_v34  ;;  %839 = vmatprep.subr.bf16.mxu0 %v974_v39  ;;  %p951_p11 = por %p950_p10, %p949_p9 }
  0x36   :  { %817 = vmatprep.subr.bf16.mxu1 %v908_v35 }
  0x37   :  { %p952_p12 = pnand %p951_p11, %p945_p8 }
  0x39   :  { %818 = vmatpush3.bf16.msra.mxu1 %v909_v36 }
  0x3a   :  { %819 = vmatprep.subr.bf16.mxu1 %v910_v37 }
  0x3d   :  { %820 = vmatpush3.bf16.msra.mxu1 %v911_v38 }
  0x3e   :  { %859 = vmatprep.subr.bf16.mxu1 %v974_v39 }
  0xeb   :  { %v134_v47 = vpop.f32.mrb[0].mxu1 }
  0xec   :  { %v135_v48 = vadd.f32 %v134_v47, %v59_v45  ;;  %v136_v49 = vpop.f32.mrb[1].mxu1 }
  0xed   :  { %v137_v51 = vadd.f32 %v136_v49, %v63_v46  ;;  %v138_v52 = vpop.f32.mrb[2].mxu1 }
  0xee   :  { %v182_v54 = vmax.f32 %v135_v48, 0.0  ;;  %v139_v55 = vpop.f32.mrb[3].mxu1 }
  0xef   :  { %v183_v56 = vmax.f32 %v137_v51, 0.0 }
  0xf0   :  { %v186_v61 = vpack.c.bf16 %v182_v54, %v182_v54 }
  0xf1   :  { %v187_v58 = vpack.c.bf16 %v183_v56, %v183_v56 }
  0xf3   :  { %v175_v62 = vpop.f32.mrb[4].mxu1  ;;  %485 = vmatprep.mubr.bf16.mxu0 %v187_v58 }
  0xf4   :  { %v176_v63 = vadd.f32 %v175_v62, %v67_v57  ;;  %v177_v0 = vpop.f32.mrb[5].mxu1  ;;  %486 = vmatmul.mubr.bf16.vlgmr.msra.gmra.mrb[0].mxu0 %v186_v61 }
  0xf5   :  { %v178_v1 = vadd.f32 %v177_v0, %v71_v59  ;;  %v179_v2 = vpop.f32.mrb[6].mxu1  ;;  %840 = vmatpush3.bf16.msra.mxu0 %v912_v60  ;;  %855 = vmatprep.mubr.msk.bf16.mxu0 %vm975_vm1, %v974_v39 }
  0xf6   :  { %v184_v4 = vmax.f32 %v176_v63, 0.0  ;;  %v180_v5 = vpop.f32.mrb[7].mxu1  ;;  %841 = vmatprep.subr.bf16.mxu0 %v974_v39 }
  0xf7   :  { %v185_v6 = vmax.f32 %v178_v1, 0.0 }
  0xf8   :  { %v188_v9 = vpack.c.bf16 %v184_v4, %v184_v4 }
  0xf9   :  { %v189_v7 = vpack.c.bf16 %v185_v6, %v185_v6  ;;  %842 = vmatpush3.bf16.msra.mxu0 %v913_v3 }
  0xfa   :  { %843 = vmatprep.subr.bf16.mxu0 %v974_v39 }
  0xfb   :  { %525 = vmatprep.mubr.bf16.mxu1 %v189_v7 }
  0xfc   :  { %526 = vmatmul.mubr.bf16.vlgmr.msra.gmra.mrb[8].mxu1 %v188_v9 }
  0xfd   :  { %844 = vmatpush3.bf16.msra.mxu0 %v914_v8  ;;  %863 = vmatprep.mubr.msk.bf16.mxu1 %vm975_vm1, %v974_v39 }
  0xfe   :  { %845 = vmatprep.subr.bf16.mxu0 %v974_v39  ;;  %860 = vmatpush3.bf16.msra.mxu1 %v920_v30 }
  0xff   :  { %861 = vmatprep.subr.bf16.mxu1 %v974_v39 }
 0x101   :  { %846 = vmatpush3.bf16.msra.mxu0 %v915_v10 }
 0x102   :  { %847 = vmatprep.subr.bf16.mxu0 %v974_v39  ;;  %862 = vmatpush3.bf16.msra.mxu1 %v921_v31 }
 0x105   :  { %848 = vmatpush3.bf16.msra.mxu0 %v916_v11 }
 0x106   :  { %849 = vmatprep.subr.bf16.mxu0 %v974_v39 }
 0x109   :  { %850 = vmatpush3.bf16.msra.mxu0 %v917_v12 }
 0x10a   :  { %851 = vmatprep.subr.bf16.mxu0 %v974_v39 }
 0x10d   :  { %852 = vmatpush3.bf16.msra.mxu0 %v918_v13 }
 0x10e   :  { %853 = vmatprep.subr.bf16.mxu0 %v974_v39  ;;  %v779_v39 = vld [vmem:[%s1130_s8] ss:$0 sm:$0xff] }
 0x111   :  { %854 = vmatpush3.bf16.msra.mxu0 %v919_v14 }
 0x1c7   :  { %v799_v15 = vpop.f32.mrb[0].mxu0 }
 0x1c8   :  { %v800_v16 = vpop.f32.mrb[1].mxu0 }
 0x1c9   :  { %v801_v17 = vadd.f32 %v800_v16, %v799_v15  ;;  %v802_v18 = vpop.f32.mrb[2].mxu0 }
 0x1ca   :  { %v803_v19 = vpop.f32.mrb[3].mxu0 }
 0x1cb   :  { %v488_v23 = vadd.f32 %v801_v17, %v737_v20 }
 0x1cf   :  { %v821_v21 = vpop.f32.mrb[8].mxu1 }
 0x1d0   :  { %v822_v22 = vpop.f32.mrb[9].mxu1 }
 0x1d1   :  { %v823_v24 = vadd.f32 %v822_v22, %v821_v21  ;;  %v824_v25 = vpop.f32.mrb[10].mxu1 }
 0x1d2   :  { %v825_v26 = vpop.f32.mrb[11].mxu1 }
 0x1d3   :  { %v528_v27 = vadd.f32 %v823_v24, %v488_v23 }
 0x1d5   :  { %v533_v28 = vmax.f32 %v528_v27, 0.0 }
 0x1d7   :  { %v534_v29 = vpack.c.bf16 %v533_v28, %v533_v28 }
 0x1d9   :  { %856 = vmatmul.mubr.bf16.vlgmr.msra.gmra.mrb[4].mxu0 %v534_v29 }
 0x2ac   :  { %v640_v33 = vpop.f32.mrb[4].mxu0 }
 0x2ad   :  { %v641_v34 = vadd.f32 %v770_v32, %v640_v33  ;;  %v857_v35 = vpop.f32.mrb[5].mxu0 }
 0x2ae   :  { %v643_v36 = vpop.f32.mrb[6].mxu0 }
 0x2af   :  { %v646_v37 = vmax.f32 %v641_v34, 0.0  ;;  %v858_v38 = vpop.f32.mrb[7].mxu0 }
 0x2b1   :  { %v647_v40 = vpack.c.bf16 %v646_v37, %v646_v37 }
 0x2b3   :  { %864 = vmatmul.mubr.msk.bf16.vlgmr.msra.gmra.mrb[12].mxu1 %vm671_vm2, %v647_v40 }
 0x386   :  { %v709_v41 = vpop.f32.mrb[12].mxu1 }
 0x387   :  { %v710_v42 = vadd.f32 %v779_v39, %v709_v41  ;;  %v865_v43 = vpop.f32.mrb[13].mxu1 }
 0x388   :  { %v712_v44 = vpop.f32.mrb[14].mxu1 }
 0x389   :  { %715 = vst [vmem:[#allocation5] sm:$0xff] %v710_v42  ;;  %v866_v45 = vpop.f32.mrb[15].mxu1 }
 0x38a   :  { %955 = shalt.err (!%p952_p12)
}
 0x38b   :  { %s956_s8 = scalar_lea.hbm %s1131_s9, 128 }
 0x38c   :  { %p957_p13 = scmp.ne.s32.totalorder %s1131_s9, %s956_s8  ;;  %p960_p0 = scmp.lt.u32.totalorder %s956_s8, %s1131_s9 }
 0x38e   :  { %p962_p1 = pnand %p960_p0, %p957_p13 }
 0x390   :  { %965 = shalt.err (!%p962_p1)
}
 0x391   :  { %725 = dma.vmem_to_hbm [thread:$0]  %s723_s7, 128, %s1131_s9, [#allocation4]  }
 0x392   :  { %968 = dma.done.wait [#allocation4], 128  }
 0x393   :  { %969 = vsyncadd [#allocation4], 4294967168 }
 0x394   :  { %729 = vsyncpa [#allocation3], 1 }
 0x395   :  { %730 = vsyncpa [#allocation4], 1 }

</bundles_post_ra>
